<compile_context>
chip_gen: v7x
topology: tpu7x:2x2x1
jax: 0.10.0
libtpu: 0.0.40
codegen_flags: <defaults>
</compile_context>

<pallas_src>
import jax
import jax.numpy as jnp
from jax import lax
from jax.experimental import pallas as pl
from jax.experimental.pallas import tpu as pltpu


def _round_up(a: int, b: int) -> int:
    return (a + b - 1) // b * b


def _chip_info():
    """Best-effort (vmem_bytes, tensorcores_per_chip) with safe fallbacks."""
    vmem_bytes, n_cores = 64 << 20, 2            # conservative (v7x-like) default
    try:
        kind = jax.devices()[0].device_kind.lower()
        if "v5 lite" in kind or "v5e" in kind or "v5litepod" in kind:
            vmem_bytes, n_cores = 128 << 20, 1
        elif "v6" in kind:
            vmem_bytes, n_cores = 128 << 20, 1
        elif "v7" in kind:
            vmem_bytes, n_cores = 64 << 20, 2
    except Exception:
        pass
    try:  # authoritative VMEM capacity when available
        vmem_bytes = int(pltpu.get_tpu_info().vmem_capacity_bytes)
    except Exception:
        pass
    return vmem_bytes, n_cores


def _pick_tile_t(max_t, T, B, F, H, x_itemsize, vmem_bytes, n_cores):
    # Lane-aligned (multiple of 128) so the (1, tile_t) output block stores are
    # full-width vst (no masked partial stores).
    tile = max(128, min(2048, _round_up(max_t, 128)))
    # Keep the input time-block within the array extent when possible; the
    # ragged tail is still handled by Pallas's partial-block clamping.
    if T >= 128:
        tile = min(tile, (T // 128) * 128)
    # Multi-TensorCore chips (v7x): keep >= ~3 grid steps per core when there
    # is enough work so each core has DMA/compute overlap.  Single-TC chips
    # (v5e/v6e) skip this and keep the largest tile.
    if n_cores > 1 and B * max_t >= 512:
        nt_target = -(-(3 * n_cores) // B)                       # ceil
        tile = min(tile, max(128, _round_up(-(-max_t // nt_target), 128)))
    # VMEM budget: double-buffered x/out blocks, f32 hidden intermediate,
    # double-buffered resident weights; leave headroom for compiler internals.
    budget = vmem_bytes // 2
    def footprint(t):
        return (2 * t * F * x_itemsize                 # x blocks (double buffered)
                + t * H * 4                            # f32 hidden activations
                + 2 * t * 4                            # output blocks
                + 2 * (F * H * x_itemsize + 2 * H * 4 + 4))  # weights / biases
    while tile > 128 and footprint(tile) > budget:
        tile -= 128
    return tile


def _vad_head_kernel(x_ref, w1_ref, b1_ref, w2r_ref, b2_ref, o_ref):
    # x_ref : (1, TT, F) compute dtype     w1_ref : (F, H) compute dtype
    # b1_ref: (1, H) f32    w2r_ref: (1, H) f32    b2_ref: (1, 1) f32 in SMEM
    # o_ref : (1, TT) f32  (lane-dense row)
    x = x_ref[0]                                                     # (TT, F)
    h = jnp.dot(x, w1_ref[...], preferred_element_type=jnp.float32)  # f32 acc
    h = jnp.maximum(h + b1_ref[...], 0.0)                            # (TT, H) f32
    # Second projection as an NT contraction (contract H with H) so the result
    # is already the lane-dense (1, TT) row — no (TT, 1) column + relayout.
    y = lax.dot_general(w2r_ref[...], h, (((1,), (1,)), ((), ())),
                        preferred_element_type=jnp.float32)          # (1, TT)
    y = y + b2_ref[0, 0]
    # sigmoid(y) = 1 / (1 + exp(-y)); exp and the approximate reciprocal both
    # run on the EUP slot, keeping VALU slots free.
    o_ref[...] = pl.reciprocal(1.0 + jnp.exp(-y), approx=True).astype(o_ref.dtype)


def vad_head_pallas(x, w1, b1, w2, b2, max_t, *, compute_dtype=jnp.bfloat16):
    """m(x[:, :max_t]) where m is the 2-layer per-frame VAD head.

    x: (B, T, F).  Returns (B, min(max_t, T), 1) float32 probabilities.
    The time truncation is folded into the grid extent, so x[:, :max_t] is
    never materialised in HBM.
    """
    B, T, F = x.shape
    H = w1.shape[1]
    max_t_eff = min(max_t, T)                     # PyTorch slice semantics

    vmem_bytes, n_cores = _chip_info()
    x_itemsize = jnp.dtype(compute_dtype).itemsize
    tile_t = _pick_tile_t(max_t_eff, T, B, F, H, x_itemsize, vmem_bytes, n_cores)

    x_c = x.astype(compute_dtype)                 # no-op if already compute_dtype
    w1_c = w1.astype(compute_dtype)
    b1_f = b1.reshape(1, H).astype(jnp.float32)
    w2_row = w2.reshape(1, H).astype(jnp.float32)   # (H,1) column -> (1,H) row
    b2_s = b2.reshape(1, 1).astype(jnp.float32)

    # Degenerate corner only (T < 128 frames): lane alignment needs a 128-frame
    # block, so pad the time axis once.  Never triggers for realistic VAD input.
    if T < tile_t:
        x_c = jnp.pad(x_c, ((0, 0), (0, tile_t - T), (0, 0)))

    nt = pl.cdiv(max_t_eff, tile_t)
    t_pad = nt * tile_t                           # frames computed per batch

    out = pl.pallas_call(
        _vad_head_kernel,
        out_shape=jax.ShapeDtypeStruct((1, B * t_pad), jnp.float32),
        grid=(B, nt),
        in_specs=[
            # x read straight from (B, T, F); tail block is a clamped partial block.
            pl.BlockSpec((1, tile_t, F), lambda b, i: (b, i, 0)),
            pl.BlockSpec((F, H), lambda b, i: (0, 0)),        # W1 resident
            pl.BlockSpec((1, H), lambda b, i: (0, 0)),        # b1
            pl.BlockSpec((1, H), lambda b, i: (0, 0)),        # W2 as a row
            pl.BlockSpec(memory_space=pltpu.MemorySpace.SMEM),  # b2 scalar
        ],
        # Lane-dense (1, tile_t) output blocks; each grid step owns a unique window.
        out_specs=pl.BlockSpec((1, tile_t), lambda b, i: (0, b * nt + i)),
        compiler_params=pltpu.CompilerParams(
            dimension_semantics=("parallel", "parallel"),
            vmem_limit_bytes=int(vmem_bytes * 3 // 4),
        ),
        cost_estimate=pl.CostEstimate(
            flops=2 * B * t_pad * H * (F + 1),
            transcendentals=2 * B * t_pad,              # exp + reciprocal per frame
            bytes_accessed=(B * t_pad * F * x_itemsize + B * t_pad * 4
                            + F * H * x_itemsize + (2 * H + 1) * 4),
        ),
    )(x_c, w1_c, b1_f, w2_row, b2_s)

    # Frames in [max_t_eff, t_pad) come from beyond the truncation point or from
    # clamped (garbage) tail reads; they are discarded here, so the returned
    # array contains only valid values.
    return out.reshape(B, t_pad)[:, :max_t_eff, None]


def wrapper_forward(x, params, max_t, *, compute_dtype=jnp.bfloat16):
    """Pallas equivalent of Wrapper.forward: m(x[:, :max_t])."""
    w1, b1, w2, b2 = params
    return vad_head_pallas(x, w1, b1, w2, b2, max_t, compute_dtype=compute_dtype)


def _reference_forward(x, params, max_t):
    """Plain-JAX f32 reference for correctness checks."""
    w1, b1, w2, b2 = params
    x_t = x[:, :max_t].astype(jnp.float32)
    h = jnp.maximum(jnp.einsum("btf,fh->bth", x_t, w1) + b1[0], 0.0)
    y = jnp.einsum("bth,ho->bto", h, w2) + b2[0]
    return jax.nn.sigmoid(y)


if __name__ == "__main__":
    # Small but non-trivial shapes: max_t is not a multiple of the 128-frame
    # tile (exercises the clamped ragged tail block) and max_t < T (exercises
    # the truncation-via-grid-extent path).
    B, T, F, H = 2, 200, 32, 32
    MAX_T = 136

    key = jax.random.PRNGKey(0)
    kx, k1, k2, k3, k4 = jax.random.split(key, 5)

    x = jax.random.normal(kx, (B, T, F), dtype=jnp.float32)

    # Deterministic synthetic parameters for the inner VAD head `m`.
    w1 = jax.random.normal(k1, (F, H), dtype=jnp.float32) * 0.1
    b1 = jax.random.normal(k2, (1, H), dtype=jnp.float32) * 0.1
    w2 = jax.random.normal(k3, (H, 1), dtype=jnp.float32) * 0.1
    b2 = jax.random.normal(k4, (1, 1), dtype=jnp.float32) * 0.1
    params = (w1, b1, w2, b2)

    ref = _reference_forward(x, params, MAX_T)

    # f32 path (structural check, tight-ish tolerance; approx reciprocal only).
    out_f32 = jax.block_until_ready(
        wrapper_forward(x, params, MAX_T, compute_dtype=jnp.float32))
    assert out_f32.shape == (B, MAX_T, 1), out_f32.shape
    assert jnp.allclose(out_f32, ref, atol=5e-3), "f32 path mismatch vs reference"

    # Default bf16-input path (half the HBM read traffic; f32 accumulation).
    out_bf16 = jax.block_until_ready(wrapper_forward(x, params, MAX_T))
    assert out_bf16.shape == (B, MAX_T, 1), out_bf16.shape
    assert jnp.allclose(out_bf16, ref, atol=3e-2), "bf16 path mismatch vs reference"

    print("KERNEL_OK")
</pallas_src>

<mosaic_0001>
module attributes {stable_mosaic.version = 11 : i64} {
  func.func @_vad_head_kernel(%arg0: i32, %arg1: i32, %arg2: memref<1x128x32xf32, #tpu.memory_space<vmem>>, %arg3: memref<32x32xf32, #tpu.memory_space<vmem>>, %arg4: memref<1x32xf32, #tpu.memory_space<vmem>>, %arg5: memref<1x32xf32, #tpu.memory_space<vmem>>, %arg6: memref<1x1xf32, #tpu.memory_space<smem>>, %arg7: memref<1x128xf32, #tpu.memory_space<vmem>>) attributes {dimension_semantics = [#tpu.dimension_semantics<parallel>, #tpu.dimension_semantics<parallel>], iteration_bounds = array<i64: 2, 2>, scalar_prefetch = 0 : i64, scratch_operands = 0 : i64, tpu.core_type = #tpu.core_type<tc>, window_params = [{transform_indices = @transform_0, window_bounds = array<i64: 1, 128, 32>}, {pipeline_mode = #tpu.pipeline_mode<synchronous>, transform_indices = @transform_1, window_bounds = array<i64: 32, 32>}, {pipeline_mode = #tpu.pipeline_mode<synchronous>, transform_indices = @transform_2, window_bounds = array<i64: 1, 32>}, {pipeline_mode = #tpu.pipeline_mode<synchronous>, transform_indices = @transform_3, window_bounds = array<i64: 1, 32>}, {transform_indices = @transform_4, window_bounds = array<i64: 1, 1>}, {transform_indices = @transform_5, window_bounds = array<i64: 1, 128>}]} {
    %c0 = arith.constant 0 : index
    %c0_0 = arith.constant 0 : index
    %c0_1 = arith.constant 0 : index
    %0 = vector.load %arg2[%c0, %c0_0, %c0_1] : memref<1x128x32xf32, #tpu.memory_space<vmem>>, vector<1x128x32xf32>
    %1 = vector.shape_cast %0 : vector<1x128x32xf32> to vector<128x32xf32>
    %c0_2 = arith.constant 0 : index
    %c0_3 = arith.constant 0 : index
    %2 = vector.load %arg3[%c0_2, %c0_3] : memref<32x32xf32, #tpu.memory_space<vmem>>, vector<32x32xf32>
    %cst = arith.constant dense<0.000000e+00> : vector<128x32xf32>
    %3 = tpu.matmul %1, %2, %cst {dimension_numbers = #tpu.dot_dimension_numbers<[1], [0], [0], [1], [0, 0, 1, 1], [], []>} : vector<128x32xf32>, vector<32x32xf32>, vector<128x32xf32> -> vector<128x32xf32>
    %c0_4 = arith.constant 0 : index
    %c0_5 = arith.constant 0 : index
    %4 = vector.load %arg4[%c0_4, %c0_5] : memref<1x32xf32, #tpu.memory_space<vmem>>, vector<1x32xf32>
    %5 = vector.broadcast %4 : vector<1x32xf32> to vector<128x32xf32>
    %6 = arith.addf %3, %5 : vector<128x32xf32>
    %cst_6 = arith.constant 0.000000e+00 : f32
    %7 = vector.broadcast %cst_6 : f32 to vector<128x32xf32>
    %8 = arith.maximumf %6, %7 : vector<128x32xf32>
    %c0_7 = arith.constant 0 : index
    %c0_8 = arith.constant 0 : index
    %9 = vector.load %arg5[%c0_7, %c0_8] : memref<1x32xf32, #tpu.memory_space<vmem>>, vector<1x32xf32>
    %cst_9 = arith.constant dense<0.000000e+00> : vector<1x128xf32>
    %10 = tpu.matmul %9, %8, %cst_9 {dimension_numbers = #tpu.dot_dimension_numbers<[1], [1], [0], [0], [0, 0, 1, 0], [], []>} : vector<1x32xf32>, vector<128x32xf32>, vector<1x128xf32> -> vector<1x128xf32>
    %c0_10 = arith.constant 0 : index
    %c0_11 = arith.constant 0 : index
    %11 = memref.load %arg6[%c0_10, %c0_11] : memref<1x1xf32, #tpu.memory_space<smem>>
    %12 = vector.broadcast %11 : f32 to vector<1x128xf32>
    %13 = arith.addf %10, %12 : vector<1x128xf32>
    %cst_12 = arith.constant 0.000000e+00 : f32
    %14 = vector.broadcast %cst_12 : f32 to vector<1x128xf32>
    %15 = arith.subf %14, %13 : vector<1x128xf32>
    %16 = math.exp %15 : vector<1x128xf32>
    %cst_13 = arith.constant 1.000000e+00 : f32
    %17 = vector.broadcast %cst_13 : f32 to vector<1x128xf32>
    %18 = arith.addf %17, %16 : vector<1x128xf32>
    %19 = tpu.reciprocal %18 {approx = true} : vector<1x128xf32> -> vector<1x128xf32>
    %c0_14 = arith.constant 0 : index
    %c0_15 = arith.constant 0 : index
    %20 = vector.load %arg7[%c0_14, %c0_15] : memref<1x128xf32, #tpu.memory_space<vmem>>, vector<1x128xf32>
    tpu.vector_store %arg7[%c0_14, %c0_15], %19 {strides = array<i32>} : memref<1x128xf32, #tpu.memory_space<vmem>>, vector<1x128xf32>,
    return
  }
  func.func @transform_0(%arg0: i32, %arg1: i32) -> (i32, i32, i32) {
    %c0_i32 = arith.constant 0 : i32
    %c0_i32_0 = arith.constant 0 : i32
    return %arg0, %arg1, %c0_i32 : i32, i32, i32
  }
  func.func @transform_1(%arg0: i32, %arg1: i32) -> (i32, i32) {
    %c0_i32 = arith.constant 0 : i32
    %c0_i32_0 = arith.constant 0 : i32
    %c0_i32_1 = arith.constant 0 : i32
    return %c0_i32, %c0_i32_0 : i32, i32
  }
  func.func @transform_2(%arg0: i32, %arg1: i32) -> (i32, i32) {
    %c0_i32 = arith.constant 0 : i32
    %c0_i32_0 = arith.constant 0 : i32
    %c0_i32_1 = arith.constant 0 : i32
    return %c0_i32, %c0_i32_0 : i32, i32
  }
  func.func @transform_3(%arg0: i32, %arg1: i32) -> (i32, i32) {
    %c0_i32 = arith.constant 0 : i32
    %c0_i32_0 = arith.constant 0 : i32
    %c0_i32_1 = arith.constant 0 : i32
    return %c0_i32, %c0_i32_0 : i32, i32
  }
  func.func @transform_4(%arg0: i32, %arg1: i32) -> (i32, i32) {
    %c0_i32 = arith.constant 0 : i32
    %c0_i32_0 = arith.constant 0 : i32
    %c0_i32_1 = arith.constant 0 : i32
    return %c0_i32, %c0_i32_0 : i32, i32
  }
  func.func @transform_5(%arg0: i32, %arg1: i32) -> (i32, i32) {
    %c2_i32 = arith.constant 2 : i32
    %0 = arith.muli %arg0, %c2_i32 : i32
    %1 = arith.addi %0, %arg1 : i32
    %c0_i32 = arith.constant 0 : i32
    %c0_i32_0 = arith.constant 0 : i32
    return %c0_i32, %1 : i32, i32
  }
}

</mosaic_0001>

<bundles_post_ra>
// kernel: tpu_custom_call.1
= control target key start
LH: loop header
LB: loop body
LE: loop exit
PB: predicated region body
PF: predicated region fallthrough
CT: control target
= control target key end

     0   :  { %s1355_s0 = inlined_call_operand.vmem [shape: f32[2,200,32], index: 0, kind: input, shape index: {}]   ;;  %s1356_s1 = inlined_call_operand.vmem [shape: f32[32,32], index: 1, kind: input, shape index: {}]   ;;  %s1357_s2 = inlined_call_operand.vmem [shape: f32[1,32], index: 2, kind: input, shape index: {}]   ;;  %s1358_s3 = inlined_call_operand.vmem [shape: f32[1,32], index: 3, kind: input, shape index: {}]   ;;  %s1359_s4 = inlined_call_operand.<no memory space> [shape: f32[1,1], index: 4, kind: input, shape index: {}]   ;;  %s1360_s5 = inlined_call_operand.hbm [shape: f32[1,512], index: 5, kind: output, shape index: {}]  }
   0x1   :  { %10 = sst [smem:[#allocation2]] %s1359_s4 }
   0x2   :  { %11 = vsyncpa [#allocation4], 0 }
   0x3   :  { %13 = vsyncpa [#allocation4 + $0x1], 0  ;;  %s1136_s20 = smov 0   ;;  %s1138_s21 = smov 0  }
   0x4   :  { %s1140_s22 = smov 0   ;;  %s1142_s23 = smov 0  }
   0x5   :  { %s1144_s24 = smov 0   ;;  %s1146_s25 = smov 0  }
   0x6   :  { %s1148_s26 = smov 0   ;;  %s1150_s27 = smov 0  }
   0x7 LB: > { %s733_s4 = sadd.s32 4294967295, %s1097_s27   ;;  %s28_s28 = sadd.s32 1, %s1089_s25  ;;  %s1097_s27 = sphi %s1150_s27, %s19_s27   ;;  %s1093_s26 = sphi %s1148_s26, %s1371_s26   ;;  %s1089_s25 = sphi %s1146_s25, %s1370_s25   ;;  %s1085_s24 = sphi %s1144_s24, %s1369_s24   ;;  %s1081_s23 = sphi %s1142_s23, %s1368_s23   ;;  %s1077_s22 = sphi %s1140_s22, %s1367_s22   ;;  %s1073_s21 = sphi %s1138_s21, %s1366_s21   ;;  %s1069_s20 = sphi %s1136_s20, %s1365_s20  }
   0x8   : > { %s31_s29 = sadd.s32 1, %s1093_s26  ;;  %p29_p0 = scmp.ge.s32.totalorder %s28_s28, 2 }
   0x9   : > { %s735_s30 = sshll.u32 %s1093_s26, 1  ;;  %s734_s6 = sadd.s32 4294967294, %s1097_s27  }
   0xa   : > { %s148_s7 = sadd.s32 %s1089_s25, %s735_s30  ;;  %s1373_s28 = smov (%p29_p0, %s28_s28), 0 }
   0xb   : > { %s1375_s29 = smov (!%p29_p0, %s31_s29), %s1093_s26  ;;  %p164_p1 = scmp.ne.s32.totalorder %s1077_s22, %s1073_s21 }
   0xc   : > { %p165_p2 = scmp.eq.s32.totalorder %s733_s4, 3  ;;  %p33_p3 = scmp.ge.s32.totalorder %s1375_s29, 2 }
   0xd   : > { %p170_p4 = scmp.ne.s32.totalorder %s1073_s21, %s1069_s20  ;;  %p171_p6 = scmp.eq.s32.totalorder %s734_s6, 3 }
   0xe   : > { %p1189_p5 = por %p165_p2, %p164_p1  ;;  %s1377_s29 = smov (%p33_p3, %s1375_s29), 0 }
   0xf   : > { %p1195_p7 = por %p171_p6, %p170_p4  ;;  %p739_p8 = scmp.ge.s32.totalorder %s1097_s27, 1 }
  0x10   : > { %s736_s10 = sshll.u32 %s1377_s29, 1  ;;  %p222_p9 = scmp.lt.s32.totalorder %s1097_s27, 5 }
  0x11   : > { %s150_s11 = sadd.s32 %s736_s10, %s1373_s28  ;;  %s154_s12 = sadd.s32 1, %s1077_s22 }
  0x12   : > { %s151_s13 = ssub.s32 %s148_s7, %s150_s11  ;;  %p223_p10 = pnand %p739_p8, %p222_p9 }
  0x13   : > { %p152_p11 = scmp.eq.s32.totalorder %s151_s13, 0  ;;  %v293_v0 = vld [vmem:[%s1356_s1] sm:$0xff] (!%p223_p10)  ;;  %v294_v1 = vld [vmem:[%s1356_s1 + $0x8] sm:$0xff] (!%p223_p10)  ;;  %v295_v2 = vld [vmem:[%s1356_s1 + $0x10] sm:$0xff] (!%p223_p10)  ;;  %s740_s30 = sshll.u32 (!%p223_p10), %s1081_s23, 4  ;;  %vm304_vm0 = vcmask (!%p223_p10), 261120  }
  0x14   : > { %226 = sbr.rel (%p223_p10) target bundleno = 574 (0x23e), region = 40  ;;  %p262_p12 = scmp.lt.s32.totalorder (!%p223_p10), %s1085_s24, 1  ;;  %v884_v3 = vpack.c.bf16 (!%p223_p10), %v294_v1, %v293_v0  ;;  %v296_v4 = vld [vmem:[%s1356_s1 + $0x18] sm:$0xff] (!%p223_p10)  ;;  %v1099_v22 = vmov (!%p223_p10), 0.0|0.0   ;;  %vm1100_vm1 = vmmov (!%p223_p10), 0   ;;  %v1101_v23 = vmov (!%p223_p10), 0.0   ;;  %vm1265_vm2 = vmpackc.low (!%p223_p10), %vm304_vm0, %vm304_vm0 }
  0x15   : > { %s1205_s14 = scalar_select %p152_p11, %s1077_s22, %s154_s12  }
  0x16   : > { %p264_p13 = scmp.lt.s32.totalorder (!%p223_p10), %s740_s30, 24  ;;  %v888_v5 = vpack.c.bf16 (!%p223_p10), %v296_v4, %v295_v2  ;;  %885 = vmatprep.subr.bf16.mxu0 (!%p223_p10), %v884_v3  ;;  %892 = vmatprep.subr.bf16.mxu1 (!%p223_p10), %v1099_v22  ;;  %v742_v24 = vld [vmem:[%s1357_s2] ss:$0 sm:$0xff] (!%p223_p10)  ;;  %s515_s6 = sld [smem:[#allocation2]] (!%p223_p10) }
  0x17   : > { %887 = vmatpush3.bf16.msra.mxu0 (!%p223_p10), %v884_v3  ;;  %881 = vmatprep.mubr.msk.f32.mxu1 (!%p223_p10), %vm1100_vm1, %v1101_v23  ;;  %s255_s7 = sand.u32 (!%p223_p10), 1, %s1073_s21  }
  0x18   : > { %889 = vmatprep.subr.bf16.mxu0 (!%p223_p10), %v888_v5  ;;  %s645_s19 = scalar_lea.sflag (!%p223_p10), [#allocation4], %s255_s7 }
  0x1b   : > { %s263_s10 = scalar_select %p262_p12, %s1085_s24, 1  ;;  %891 = vmatpush3.bf16.msra.mxu0 %v888_v5 }
  0x1c   : > { %s1379_s30 = smov (!%p264_p13, %s740_s30), 24 }
  0x1d   : > { %s924_s11 = smul.u32 25, %s263_s10  ;;  %s776_s10 = sshll.u32 %s1085_s24, 1 }
  0x1f   : > { %s267_s12 = sadd.s32 %s924_s11, %s1379_s30  ;;  %s652_s11 = sadd.s32 %s1081_s23, %s776_s10 }
  0x20   : > { %s741_s13 = sshll.u32 %s267_s12, 3  ;;  %s777_s12 = sshll.u32 %s652_s11, 4 }
  0x21   : > { %s1225_s17 = scalar_lea.vmem %s1355_s0, %s741_s13  ;;  %s256_s13 = scalar_lea.vmem [#allocation3], %s255_s7 }
  0x22   : > { %v277_v6 = vld [vmem:[%s1225_s17] sm:$0xff]  ;;  %v278_v7 = vld [vmem:[%s1225_s17 + $0x8] sm:$0xff]  ;;  %v279_v8 = vld [vmem:[%s1225_s17 + $0x10] sm:$0xff]  ;;  %s659_s15 = sshll.u32 %s256_s13, 4  ;;  %s1302_s18 = scalar_lea.hbm %s1360_s5, %s777_s12  ;;  %s1304_s15 = int_to_ptr.vmem [resolvable:$true] %s659_s15 }
  0x23   : > { %825 = vmatprep.mubr.msk.f32.mxu0 %vm304_vm0, %v277_v6  ;;  %v280_v9 = vld [vmem:[%s1225_s17 + $0x18] sm:$0xff]  ;;  %v281_v10 = vld [vmem:[%s1225_s17 + $0x20] sm:$0xff]  ;;  %v282_v11 = vld [vmem:[%s1225_s17 + $0x28] sm:$0xff]  ;;  %s1003_s4 = scalar_lea.vmem %s1304_s15, 16  ;;  %s1102_s23 = smov [#allocation3]  }
  0x24   : > { %826 = vmatmul.mubr.msk.f32.vlgmr.msra.gmra.mrb[0].mxu0 %vm304_vm0, %v278_v7  ;;  %v283_v12 = vld [vmem:[%s1225_s17 + $0x30] sm:$0xff]  ;;  %v284_v13 = vld [vmem:[%s1225_s17 + $0x38] sm:$0xff]  ;;  %v285_v14 = vld [vmem:[%s1225_s17 + $0x40] sm:$0xff]  ;;  %p1004_p0 = scmp.ne.s32.totalorder %s1304_s15, %s1003_s4  ;;  %s1007_s24 = sshll.u32 %s1102_s23, 4  ;;  %s1008_s24 = int_to_ptr.vmem [resolvable:$false] %s1007_s24 }
  0x25   : > { %828 = vmatprep.mubr.msk.f32.mxu0 %vm304_vm0, %v279_v8  ;;  %v286_v15 = vld [vmem:[%s1225_s17 + $0x48] sm:$0xff]  ;;  %v287_v16 = vld [vmem:[%s1225_s17 + $0x50] sm:$0xff]  ;;  %v288_v17 = vld [vmem:[%s1225_s17 + $0x58] sm:$0xff]  ;;  %s1009_s30 = scalar_lea.vmem %s1008_s24, 32  ;;  %p1010_p3 = scmp.lt.s32.totalorder %s1304_s15, %s1008_s24 }
  0x26   : > { %v289_v18 = vld [vmem:[%s1225_s17 + $0x60] sm:$0xff]  ;;  %v290_v19 = vld [vmem:[%s1225_s17 + $0x68] sm:$0xff]  ;;  %v291_v20 = vld [vmem:[%s1225_s17 + $0x70] sm:$0xff]  ;;  %p1005_p1 = pnand %p1004_p0, %p1189_p5  ;;  %p1011_p4 = scmp.lt.s32.totalorder %s1009_s30, %s1003_s4 }
  0x27   : > { %v292_v21 = vld [vmem:[%s1225_s17 + $0x78] sm:$0xff] }
  0x28   : > { %829 = vmatmul.mubr.msk.f32.gmra.mrb[2].mxu0 %vm304_vm0, %v280_v9  ;;  %p1006_p2 = pneg %p1005_p1  ;;  %p1012_p6 = por %p1011_p4, %p1010_p3 }
  0x29   : > { %831 = vmatprep.mubr.msk.f32.mxu0 %vm304_vm0, %v281_v10 }
  0x2a   : > { %p1013_p8 = pnand %p1012_p6, %p1006_p2 }
  0x2c   : > { %832 = vmatmul.mubr.msk.f32.gmra.mrb[4].mxu0 %vm304_vm0, %v282_v11 }
  0x2d   : > { %834 = vmatprep.mubr.msk.f32.mxu0 %vm304_vm0, %v283_v12 }
  0x30   : > { %835 = vmatmul.mubr.msk.f32.gmra.mrb[6].mxu0 %vm304_vm0, %v284_v13 }
  0x31   : > { %837 = vmatprep.mubr.msk.f32.mxu0 %vm304_vm0, %v285_v14 }
  0x34   : > { %838 = vmatmul.mubr.msk.f32.gmra.mrb[8].mxu0 %vm304_vm0, %v286_v15 }
  0x35   : > { %840 = vmatprep.mubr.msk.f32.mxu0 %vm304_vm0, %v287_v16 }
  0x38   : > { %841 = vmatmul.mubr.msk.f32.gmra.mrb[10].mxu0 %vm304_vm0, %v288_v17 }
  0x39   : > { %843 = vmatprep.mubr.msk.f32.mxu0 %vm304_vm0, %v289_v18  ;;  %v514_v18 = vld [vmem:[%s1358_s3] sm:$0x1] }
  0x3c   : > { %844 = vmatmul.mubr.msk.f32.gmra.mrb[12].mxu0 %vm304_vm0, %v290_v19  ;;  %v516_v19 = vstv %s515_s6 }
  0x3d   : > { %846 = vmatprep.mubr.msk.f32.mxu0 %vm304_vm0, %v291_v20 }
  0x40   : > { %847 = vmatmul.mubr.msk.f32.gmra.mrb[14].mxu0 %vm304_vm0, %v292_v21 }
  0xf7   : > { %v827_v25 = vpop.f32.mrb[0].mxu0 }
  0xf8   : > { %v425_v26 = vadd.f32 %v827_v25, %v742_v24  ;;  %v419_v27 = vpop.f32.mrb[1].mxu0 }
  0xf9   : > { %v420_v28 = vadd.f32 %v742_v24, %v419_v27 }
  0xfa   : > { %v499_v29 = vmax.f32 %v425_v26, 0.0 }
  0xfb   : > { %v498_v30 = vmax.f32 %v420_v28, 0.0  ;;  %v830_v31 = vpop.f32.mrb[2].mxu0 }
  0xfc   : > { %v435_v32 = vadd.f32 %v830_v31, %v742_v24  ;;  %v429_v33 = vpop.f32.mrb[3].mxu0 }
  0xfd   : > { %v893_v35 = vpack.c.bf16 %v499_v29, %v498_v30  ;;  %v430_v36 = vadd.f32 %v742_v24, %v429_v33 }
  0xfe   : > { %v501_v37 = vmax.f32 %v435_v32, 0.0 }
  0xff   : > { %v500_v38 = vmax.f32 %v430_v36, 0.0  ;;  %895 = vmatpush3.bf16.xpose.msk.msra.mxu1 %vm1265_vm2, %v893_v35  ;;  %v833_v39 = vpop.f32.mrb[4].mxu0 }
 0x100   : > { %v445_v40 = vadd.f32 %v833_v39, %v742_v24  ;;  %896 = vmatprep.subr.bf16.mxu1 %v1099_v22  ;;  %v439_v41 = vpop.f32.mrb[5].mxu0 }
 0x101   : > { %v897_v42 = vpack.c.bf16 %v501_v37, %v500_v38  ;;  %v440_v43 = vadd.f32 %v742_v24, %v439_v41 }
 0x102   : > { %v503_v44 = vmax.f32 %v445_v40, 0.0 }
 0x103   : > { %v502_v45 = vmax.f32 %v440_v43, 0.0  ;;  %v836_v46 = vpop.f32.mrb[6].mxu0 }
 0x104   : > { %v455_v47 = vadd.f32 %v836_v46, %v742_v24  ;;  %v449_v48 = vpop.f32.mrb[7].mxu0 }
 0x105   : > { %v901_v49 = vpack.c.bf16 %v503_v44, %v502_v45  ;;  %v450_v50 = vadd.f32 %v742_v24, %v449_v48 }
 0x106   : > { %v505_v51 = vmax.f32 %v455_v47, 0.0 }
 0x107   : > { %899 = vmatpush3.bf16.xpose.msk.msra.mxu1 %vm1265_vm2, %v897_v42  ;;  %v504_v52 = vmax.f32 %v450_v50, 0.0  ;;  %v839_v53 = vpop.f32.mrb[8].mxu0 }
 0x108   : > { %900 = vmatprep.subr.bf16.mxu1 %v1099_v22  ;;  %v465_v54 = vadd.f32 %v839_v53, %v742_v24  ;;  %v459_v55 = vpop.f32.mrb[9].mxu0 }
 0x109   : > { %v905_v56 = vpack.c.bf16 %v505_v51, %v504_v52  ;;  %v460_v57 = vadd.f32 %v742_v24, %v459_v55 }
 0x10a   : > { %v507_v58 = vmax.f32 %v465_v54, 0.0 }
 0x10b   : > { %v506_v59 = vmax.f32 %v460_v57, 0.0  ;;  %v842_v60 = vpop.f32.mrb[10].mxu0 }
 0x10c   : > { %v475_v61 = vadd.f32 %v842_v60, %v742_v24  ;;  %v469_v62 = vpop.f32.mrb[11].mxu0 }
 0x10d   : > { %v909_v63 = vpack.c.bf16 %v507_v58, %v506_v59  ;;  %v470_v0 = vadd.f32 %v742_v24, %v469_v62 }
 0x10e   : > { %v509_v1 = vmax.f32 %v475_v61, 0.0 }
 0x10f   : > { %903 = vmatpush3.bf16.xpose.msk.msra.mxu1 %vm1265_vm2, %v901_v49  ;;  %v508_v2 = vmax.f32 %v470_v0, 0.0  ;;  %v845_v3 = vpop.f32.mrb[12].mxu0 }
 0x110   : > { %904 = vmatprep.subr.bf16.mxu1 %v1099_v22  ;;  %v485_v4 = vadd.f32 %v845_v3, %v742_v24  ;;  %v479_v5 = vpop.f32.mrb[13].mxu0 }
 0x111   : > { %v913_v6 = vpack.c.bf16 %v509_v1, %v508_v2  ;;  %v480_v7 = vadd.f32 %v742_v24, %v479_v5 }
 0x112   : > { %v511_v8 = vmax.f32 %v485_v4, 0.0 }
 0x113   : > { %v510_v9 = vmax.f32 %v480_v7, 0.0  ;;  %v848_v10 = vpop.f32.mrb[14].mxu0 }
 0x114   : > { %v495_v11 = vadd.f32 %v848_v10, %v742_v24  ;;  %v489_v12 = vpop.f32.mrb[15].mxu0 }
 0x115   : > { %v917_v13 = vpack.c.bf16 %v511_v8, %v510_v9  ;;  %v490_v14 = vadd.f32 %v742_v24, %v489_v12 }
 0x116   : > { %v513_v15 = vmax.f32 %v495_v11, 0.0 }
 0x117   : > { %907 = vmatpush3.bf16.xpose.msk.msra.mxu1 %vm1265_vm2, %v905_v56  ;;  %v512_v16 = vmax.f32 %v490_v14, 0.0 }
 0x118   : > { %908 = vmatprep.subr.bf16.mxu1 %v1099_v22 }
 0x119   : > { %v921_v17 = vpack.c.bf16 %v513_v15, %v512_v16 }
 0x11f   : > { %911 = vmatpush3.bf16.xpose.msk.msra.mxu1 %vm1265_vm2, %v909_v63 }
 0x120   : > { %912 = vmatprep.subr.bf16.mxu1 %v1099_v22 }
 0x127   : > { %915 = vmatpush3.bf16.xpose.msk.msra.mxu1 %vm1265_vm2, %v913_v6 }
 0x128   : > { %916 = vmatprep.subr.bf16.mxu1 %v1099_v22 }
 0x12f   : > { %919 = vmatpush3.bf16.xpose.msk.msra.mxu1 %vm1265_vm2, %v917_v13 }
 0x130   : > { %920 = vmatprep.subr.bf16.mxu1 %v1099_v22 }
 0x137   : > { %923 = vmatpush3.bf16.xpose.msk.msra.mxu1 %vm1265_vm2, %v921_v17 }
 0x13e   : > { %882 = vmatmul.mubr.msk.f32.vlgmr.msra.gmra.mrb[0].mxu1 %vm304_vm0, %v514_v18 }
 0x211   : > { %v634_v20 = vpop.f32.mrb[0].mxu1 }
 0x212   : > { %v635_v21 = vadd.f32 %v634_v20, %v516_v19  ;;  %v883_v23 = vpop.f32.mrb[1].mxu1 }
 0x214   : > { %v638_v24 = vsub.f32 0.0, %v635_v21 }
 0x216   : > { %v639_v25 = vmul.f32 1.442695, %v638_v24 }
 0x218   : > { %999 = vpow2.f32 %v639_v25 }
 0x222   : > { %v1000_v22 = vpop.eup %999 }
 0x223   : > { %v641_v26 = vadd.f32 1.0, %v1000_v22 }
 0x225   : > { %1001 = vrcp.f32 %v641_v26 }
 0x22f   : > { %v1002_v27 = vpop.eup %1001 }
 0x230   : > { %643 = vst [vmem:[%s256_s13] sm:$0x1] %v1002_v27 }
 0x231   : > { %1016 = shalt.err (!%p1013_p8)
}
 0x232   : > { %s1017_s6 = scalar_lea.hbm %s1302_s18, 16  ;;  %s1021_s11 = scalar_lea.hbm %s1360_s5, 64 }
 0x233   : > { %p1018_p9 = scmp.ne.s32.totalorder %s1302_s18, %s1017_s6  ;;  %p1022_p12 = scmp.lt.u32.totalorder %s1302_s18, %s1360_s5 }
 0x234   : > { %p1023_p13 = scmp.lt.u32.totalorder %s1021_s11, %s1017_s6  ;;  %p1025_p1 = scmp.lt.u32.totalorder %s1017_s6, %s1302_s18 }
 0x235   : > { %p1019_p10 = pnand %p1018_p9, %p1189_p5 }
 0x236   : > { %p1024_p0 = por %p1023_p13, %p1022_p12 }
 0x237   : > { %p1020_p11 = pneg %p1019_p10 }
 0x238   : > { %p1026_p2 = por %p1025_p1, %p1024_p0 }
 0x23a   : > { %p1027_p3 = pnand %p1026_p2, %p1020_p11 }
 0x23c   : > { %1030 = shalt.err (!%p1027_p3)
}
 0x23d   : > { %925 = dma.vmem_to_hbm [thread:$0]  (%p1189_p5), %s1304_s15, 16, %s1302_s18, %s645_s19  }
 0x23e PF: > { %p931_p4 = scmp.ge.s32.totalorder %s1097_s27, 2  ;;  %s671_s16 = sand.u32 1, %s1069_s20  }
 0x23f   : > { %s672_s17 = scalar_lea.sflag [#allocation4], %s671_s16 }
 0x240   : > { %p928_p6 = pnand %p931_p4, %p1195_p7 }
 0x242   : > { %1064 = dma.done.wait (!%p928_p6), %s672_s17, 16  }
 0x243   : > { %1066 = vsyncadd (!%p928_p6), %s672_s17, 4294967280  ;;  %s19_s27 = sadd.s32 1, %s1097_s27   ;;  %s1365_s20 = smov %s1073_s21 }
 0x244   : > { %p16_p8 = scmp.ge.s32.totalorder %s19_s27, 6   ;;  %s1366_s21 = smov %s1077_s22 }
 0x245   : > { %s1367_s22 = smov %s1205_s14  ;;  %s1368_s23 = smov %s1089_s25 }
 0x246   : > { %s1369_s24 = smov %s1093_s26  ;;  %s1370_s25 = smov %s1373_s28 }
 0x247   : > { %s1371_s26 = smov %s1377_s29  ;;  %18 = sbr.rel (!%p16_p8) target bundleno = 7 (0x7), region = 75 }
 0x24e   :  { %676 = vsyncpa [#allocation4], 1 }
 0x24f   :  { %678 = vsyncpa [#allocation4 + $0x1], 1 }

</bundles_post_ra>
